<compile_context>
chip_gen: v6e
topology: v6e:2x2x1
jax: 0.10.0
libtpu: 0.0.40
codegen_flags: <defaults>
</compile_context>

<pallas_src>
import functools
import math

import jax
import jax.numpy as jnp
from jax import lax
from jax.experimental import pallas as pl
from jax.experimental.pallas import tpu as pltpu

_LANE = 128
_MAX_BLOCK_BYTES = 4 * 1024 * 1024  # per input, per pipeline buffer


def _round_up(x, m):
    return ((x + m - 1) // m) * m


def _round_down(x, m):
    return (x // m) * m


def _psnr_kernel(t_ref, f_ref, out_ref, acc_ref, *,
                 chw, tile_c, needs_mask, chunked, c0, c1):
    """Grid = (batch_blocks, col_blocks). t_ref/f_ref: (B_TILE, TILE_C) tiles."""
    j = pl.program_id(1)
    nj = pl.num_programs(1)

    # Zero the per-sample-block SSE accumulator at the start of each sample block.
    @pl.when(j == 0)
    def _init():
        acc_ref[...] = jnp.zeros_like(acc_ref)

    # Elementwise path (VPU): cast -> clamp -> diff -> square.
    # data_range cancels algebraically in PSNR, so no per-element scaling.
    t = jnp.clip(t_ref[...].astype(jnp.float32), 0.0, 1.0)
    f = jnp.clip(f_ref[...].astype(jnp.float32), 0.0, 1.0)
    d = t - f
    d2 = d * d

    def _accum(x):
        if chunked:
            # Fold the lane axis into 128-wide per-lane partial sums with a
            # balanced tree of pure VPU adds (short dependency chain); the
            # cross-lane XLU reduce is deferred to the per-sample finalize.
            chunks = [x[:, k * _LANE:(k + 1) * _LANE]
                      for k in range(tile_c // _LANE)]
            while len(chunks) > 1:
                nxt = [a + b for a, b in zip(chunks[0::2], chunks[1::2])]
                if len(chunks) % 2:
                    nxt.append(chunks[-1])
                chunks = nxt
            acc_ref[...] += chunks[0]
        else:
            acc_ref[...] += jnp.sum(x, axis=1, keepdims=True)

    if needs_mask:
        # Ragged last column block: out-of-range lanes hold garbage reads
        # (Pallas does no OOB zero-fill) -> select them to zero.
        @pl.when(j == nj - 1)
        def _tail():
            col = j * tile_c + lax.broadcasted_iota(jnp.int32, d2.shape, 1)
            _accum(jnp.where(col < chw, d2, 0.0))

        @pl.when(j < nj - 1)
        def _body():
            _accum(d2)
    else:
        _accum(d2)

    # Finalize this sample block: cross-lane reduce -> log -> per-sample PSNR.
    @pl.when(j == nj - 1)
    def _finalize():
        sse = jnp.sum(acc_ref[...], axis=1, keepdims=True)       # (B_TILE, 1)
        # psnr = 10*log(dr^2/mse)/ln10 == c1 - c0*log(sse), c1 = c0*log(chw)
        out_ref[...] = c1 - c0 * jnp.log(sse)


def psnr_loss(im_true, im_fake, data_range=1.0):
    assert im_true.shape == im_fake.shape
    assert im_true.ndim == 4, "expected NCHW input"
    n, c, h, w = im_true.shape
    chw = c * h * w
    del data_range  # cancels algebraically in PSNR (dr^2 / (dr^2 * mse0))

    # Free contiguous reshape; native dtype (cast happens in-kernel).
    t = im_true.reshape(n, chw)
    f = im_fake.reshape(n, chw)

    itemsize = jnp.dtype(im_true.dtype).itemsize
    target_elems = max(_LANE, _MAX_BLOCK_BYTES // itemsize)

    # --- rows (samples) per block: multiple of 8 (sublane-dense) or full N ---
    if n <= 8:
        b_tile = n
    else:
        fit = max(8, _round_down(target_elems // max(chw, 1), 8))
        b_tile = min(fit, _round_up(n, 8))
    b_pad = _round_up(b_tile, 8)  # sublanes actually resident in VMEM

    # --- columns (pixels) per block: multiple of 128 (lane-dense) or full CHW ---
    col_budget = max(_LANE, target_elems // b_pad)
    if chw <= col_budget:
        tile_c = chw                                  # full row; legal block dim
    else:
        tile_c = _round_down(col_budget, _LANE)

    nb = pl.cdiv(n, b_tile)
    nj = pl.cdiv(chw, tile_c)
    needs_mask = (chw % tile_c) != 0
    chunked = (tile_c % _LANE) == 0

    c0 = 10.0 / math.log(10.0)
    c1 = c0 * math.log(float(chw))
    acc_lanes = _LANE if chunked else 1

    grid_spec = pltpu.PrefetchScalarGridSpec(
        num_scalar_prefetch=0,
        grid=(nb, nj),
        in_specs=[
            pl.BlockSpec((b_tile, tile_c), lambda i, j: (i, j)),
            pl.BlockSpec((b_tile, tile_c), lambda i, j: (i, j)),
        ],
        out_specs=pl.BlockSpec((b_tile, 1), lambda i, j: (i, 0)),
        scratch_shapes=[pltpu.VMEM((b_tile, acc_lanes), jnp.float32)],
    )

    out = pl.pallas_call(
        functools.partial(
            _psnr_kernel,
            chw=chw, tile_c=tile_c, needs_mask=needs_mask, chunked=chunked,
            c0=c0, c1=c1),
        out_shape=jax.ShapeDtypeStruct((nb * b_tile, 1), jnp.float32),
        grid_spec=grid_spec,
        compiler_params=pltpu.CompilerParams(
            dimension_semantics=("parallel", "arbitrary"),
            vmem_limit_bytes=32 * 1024 * 1024,
        ),
        cost_estimate=pl.CostEstimate(
            flops=7 * n * chw,
            transcendentals=n,
            bytes_accessed=2 * n * chw * itemsize + 4 * n,
        ),
    )(t, f)

    # Rows >= n (if any) are padding from the ragged last batch block; drop them.
    return jnp.mean(out[:n, 0])


# Pure-JAX reference (mirrors the PyTorch forward exactly).
def psnr_loss_ref(im_true, im_fake, data_range=1.0):
    n, c, h, w = im_true.shape
    t = jnp.clip(im_true.astype(jnp.float32), 0.0, 1.0) * data_range
    f = jnp.clip(im_fake.astype(jnp.float32), 0.0, 1.0) * data_range
    err = jnp.sum((t.reshape(n, -1) - f.reshape(n, -1)) ** 2, axis=1) / (c * h * w)
    psnr = 10.0 * jnp.log((data_range ** 2) / err) / jnp.log(10.0)
    return jnp.mean(psnr)


if __name__ == "__main__":
    key = jax.random.PRNGKey(0)
    k1, k2 = jax.random.split(key)
    shape = (2, 4, 16, 16)  # (N, C, H, W)
    # Range exercises the clamp(0, 1) path.
    im_true = jax.random.uniform(k1, shape, jnp.float32, -0.25, 1.25)
    im_fake = jax.random.uniform(k2, shape, jnp.float32, -0.25, 1.25)

    loss = psnr_loss(im_true, im_fake)
    jax.block_until_ready(loss)

    ref = psnr_loss_ref(im_true, im_fake)
    assert jnp.allclose(loss, ref, rtol=1e-4, atol=1e-4), (loss, ref)

    print("KERNEL_OK")
</pallas_src>

<mosaic_0001>
module attributes {stable_mosaic.version = 11 : i64} {
  func.func @_psnr_kernel(%arg0: i32, %arg1: i32, %arg2: memref<2x1024xf32, #tpu.memory_space<vmem>>, %arg3: memref<2x1024xf32, #tpu.memory_space<vmem>>, %arg4: memref<2x1xf32, #tpu.memory_space<vmem>>, %arg5: memref<2x128xf32, #tpu.memory_space<vmem>>) attributes {dimension_semantics = [#tpu.dimension_semantics<parallel>, #tpu.dimension_semantics<arbitrary>], iteration_bounds = array<i64: 1, 1>, scalar_prefetch = 0 : i64, scratch_operands = 1 : i64, tpu.core_type = #tpu.core_type<tc>, window_params = [{transform_indices = @transform_0, window_bounds = array<i64: 2, 1024>}, {transform_indices = @transform_1, window_bounds = array<i64: 2, 1024>}, {transform_indices = @transform_2, window_bounds = array<i64: 2, 1>}]} {
    %c0_i32 = arith.constant 0 : i32
    %0 = arith.cmpi eq, %arg1, %c0_i32 : i32
    %1 = arith.extui %0 : i1 to i32
    %c0_i32_0 = arith.constant 0 : i32
    %2 = arith.cmpi ne, %1, %c0_i32_0 : i32
    scf.if %2 {
      %cst_13 = arith.constant 0.000000e+00 : f32
      %36 = vector.broadcast %cst_13 : f32 to vector<2x128xf32>
      %c0_14 = arith.constant 0 : index
      %c0_15 = arith.constant 0 : index
      %37 = vector.load %arg5[%c0_14, %c0_15] : memref<2x128xf32, #tpu.memory_space<vmem>>, vector<2x128xf32>
      tpu.vector_store %arg5[%c0_14, %c0_15], %36 {strides = array<i32>} : memref<2x128xf32, #tpu.memory_space<vmem>>, vector<2x128xf32>,
    } else {
    }
    %c0 = arith.constant 0 : index
    %c0_1 = arith.constant 0 : index
    %3 = vector.load %arg2[%c0, %c0_1] : memref<2x1024xf32, #tpu.memory_space<vmem>>, vector<2x1024xf32>
    %cst = arith.constant 0.000000e+00 : f32
    %cst_2 = arith.constant 1.000000e+00 : f32
    %4 = vector.broadcast %cst : f32 to vector<2x1024xf32>
    %5 = arith.maximumf %4, %3 : vector<2x1024xf32>
    %6 = vector.broadcast %cst_2 : f32 to vector<2x1024xf32>
    %7 = arith.minimumf %6, %5 : vector<2x1024xf32>
    %c0_3 = arith.constant 0 : index
    %c0_4 = arith.constant 0 : index
    %8 = vector.load %arg3[%c0_3, %c0_4] : memref<2x1024xf32, #tpu.memory_space<vmem>>, vector<2x1024xf32>
    %cst_5 = arith.constant 0.000000e+00 : f32
    %cst_6 = arith.constant 1.000000e+00 : f32
    %9 = vector.broadcast %cst_5 : f32 to vector<2x1024xf32>
    %10 = arith.maximumf %9, %8 : vector<2x1024xf32>
    %11 = vector.broadcast %cst_6 : f32 to vector<2x1024xf32>
    %12 = arith.minimumf %11, %10 : vector<2x1024xf32>
    %13 = arith.subf %7, %12 : vector<2x1024xf32>
    %14 = arith.mulf %13, %13 : vector<2x1024xf32>
    %15 = vector.extract_strided_slice %14 {offsets = [0, 0], sizes = [2, 128], strides = [1, 1]} : vector<2x1024xf32> to vector<2x128xf32>
    %16 = vector.extract_strided_slice %14 {offsets = [0, 128], sizes = [2, 128], strides = [1, 1]} : vector<2x1024xf32> to vector<2x128xf32>
    %17 = vector.extract_strided_slice %14 {offsets = [0, 256], sizes = [2, 128], strides = [1, 1]} : vector<2x1024xf32> to vector<2x128xf32>
    %18 = vector.extract_strided_slice %14 {offsets = [0, 384], sizes = [2, 128], strides = [1, 1]} : vector<2x1024xf32> to vector<2x128xf32>
    %19 = vector.extract_strided_slice %14 {offsets = [0, 512], sizes = [2, 128], strides = [1, 1]} : vector<2x1024xf32> to vector<2x128xf32>
    %20 = vector.extract_strided_slice %14 {offsets = [0, 640], sizes = [2, 128], strides = [1, 1]} : vector<2x1024xf32> to vector<2x128xf32>
    %21 = vector.extract_strided_slice %14 {offsets = [0, 768], sizes = [2, 128], strides = [1, 1]} : vector<2x1024xf32> to vector<2x128xf32>
    %22 = vector.extract_strided_slice %14 {offsets = [0, 896], sizes = [2, 128], strides = [1, 1]} : vector<2x1024xf32> to vector<2x128xf32>
    %23 = arith.addf %15, %16 : vector<2x128xf32>
    %24 = arith.addf %17, %18 : vector<2x128xf32>
    %25 = arith.addf %19, %20 : vector<2x128xf32>
    %26 = arith.addf %21, %22 : vector<2x128xf32>
    %27 = arith.addf %23, %24 : vector<2x128xf32>
    %28 = arith.addf %25, %26 : vector<2x128xf32>
    %29 = arith.addf %27, %28 : vector<2x128xf32>
    %c0_7 = arith.constant 0 : index
    %c0_8 = arith.constant 0 : index
    %30 = vector.load %arg5[%c0_7, %c0_8] : memref<2x128xf32, #tpu.memory_space<vmem>>, vector<2x128xf32>
    %31 = arith.addf %30, %29 : vector<2x128xf32>
    %c0_9 = arith.constant 0 : index
    %c0_10 = arith.constant 0 : index
    %32 = vector.load %arg5[%c0_9, %c0_10] : memref<2x128xf32, #tpu.memory_space<vmem>>, vector<2x128xf32>
    tpu.vector_store %arg5[%c0_9, %c0_10], %31 {strides = array<i32>} : memref<2x128xf32, #tpu.memory_space<vmem>>, vector<2x128xf32>,
    %c0_i32_11 = arith.constant 0 : i32
    %33 = arith.cmpi eq, %arg1, %c0_i32_11 : i32
    %34 = arith.extui %33 : i1 to i32
    %c0_i32_12 = arith.constant 0 : i32
    %35 = arith.cmpi ne, %34, %c0_i32_12 : i32
    scf.if %35 {
      %c0_13 = arith.constant 0 : index
      %c0_14 = arith.constant 0 : index
      %36 = vector.load %arg5[%c0_13, %c0_14] : memref<2x128xf32, #tpu.memory_space<vmem>>, vector<2x128xf32>
      %cst_15 = arith.constant dense<0.000000e+00> : vector<2xf32>
      %37 = vector.multi_reduction <add>, %36, %cst_15 [1] : vector<2x128xf32> to vector<2xf32>
      %38 = vector.shape_cast %37 : vector<2xf32> to vector<2x1xf32>
      %39 = math.log %38 : vector<2x1xf32>
      %cst_16 = arith.constant 4.34294462 : f32
      %40 = vector.broadcast %cst_16 : f32 to vector<2x1xf32>
      %41 = arith.mulf %40, %39 : vector<2x1xf32>
      %cst_17 = arith.constant 30.1029987 : f32
      %42 = vector.broadcast %cst_17 : f32 to vector<2x1xf32>
      %43 = arith.subf %42, %41 : vector<2x1xf32>
      %c0_18 = arith.constant 0 : index
      %c0_19 = arith.constant 0 : index
      %44 = vector.load %arg4[%c0_18, %c0_19] : memref<2x1xf32, #tpu.memory_space<vmem>>, vector<2x1xf32>
      tpu.vector_store %arg4[%c0_18, %c0_19], %43 {strides = array<i32>} : memref<2x1xf32, #tpu.memory_space<vmem>>, vector<2x1xf32>,
    } else {
    }
    return
  }
  func.func @transform_0(%arg0: i32, %arg1: i32) -> (i32, i32) {
    %c0_i32 = arith.constant 0 : i32
    return %arg0, %arg1 : i32, i32
  }
  func.func @transform_1(%arg0: i32, %arg1: i32) -> (i32, i32) {
    %c0_i32 = arith.constant 0 : i32
    return %arg0, %arg1 : i32, i32
  }
  func.func @transform_2(%arg0: i32, %arg1: i32) -> (i32, i32) {
    %c0_i32 = arith.constant 0 : i32
    %c0_i32_0 = arith.constant 0 : i32
    return %arg0, %c0_i32 : i32, i32
  }
}

</mosaic_0001>

<bundles_post_ra>
// kernel: tpu_custom_call.1
= control target key start
LH: loop header
LB: loop body
LE: loop exit
PB: predicated region body
PF: predicated region fallthrough
CT: control target
= control target key end

     0   :  { %7 = vsyncpa [#allocation4], 0  ;;  %s176_s0 = inlined_call_operand.hbm [shape: f32[2,1024], index: 0, kind: input, shape index: {}]   ;;  %s177_s1 = inlined_call_operand.hbm [shape: f32[2,1024], index: 1, kind: input, shape index: {}]   ;;  %s178_s2 = inlined_call_operand.vmem [shape: f32[2,1], index: 2, kind: output, shape index: {}]  }
   0x1   :  { %8 = vsyncpa [#allocation6], 0  ;;  %s149_s9 = smov [#allocation3]   ;;  %s150_s11 = smov [#allocation5]  }
   0x2   :  { %s15_s10 = sshll.u32 %s149_s9, 4  ;;  %s25_s12 = sshll.u32 %s150_s11, 4  ;;  %s16_s10 = int_to_ptr.vmem [resolvable:$true] %s15_s10  ;;  %s26_s12 = int_to_ptr.vmem [resolvable:$true] %s25_s12 }
   0x3   :  { %s113_s13 = scalar_lea.vmem %s16_s10, 256  ;;  %p118_p1 = scmp.lt.s32.totalorder %s16_s10, %s16_s10 }
   0x4   :  { %p114_p0 = scmp.ne.s32.totalorder %s16_s10, %s113_s13  ;;  %p119_p2 = scmp.lt.s32.totalorder %s113_s13, %s113_s13 }
   0x6   :  { %p120_p3 = por %p119_p2, %p118_p1 }
   0x8   :  { %p121_p4 = pnand %p120_p3, %p114_p0 }
   0xa   :  { %124 = shalt.err (!%p121_p4)
}
   0xb   :  { %18 = dma.hbm_to_vmem [thread:$0]  %s176_s0, 256, %s16_s10, [#allocation4]  }
   0xc   :  { %s133_s16 = scalar_lea.vmem %s26_s12, 256  ;;  %p138_p6 = scmp.lt.s32.totalorder %s26_s12, %s26_s12 }
   0xd   :  { %p134_p5 = scmp.ne.s32.totalorder %s26_s12, %s133_s16  ;;  %p139_p7 = scmp.lt.s32.totalorder %s133_s16, %s133_s16 }
   0xf   :  { %p140_p8 = por %p139_p7, %p138_p6 }
  0x11   :  { %p141_p9 = pnand %p140_p8, %p134_p5 }
  0x13   :  { %144 = shalt.err (!%p141_p9)
}
  0x14   :  { %28 = dma.hbm_to_vmem [thread:$0]  %s177_s1, 256, %s26_s12, [#allocation6]  }
  0x15   :  { %145 = dma.done.wait [#allocation4], 256  }
  0x16   :  { %146 = vsyncadd [#allocation4], 4294967040 }
  0x17   :  { %147 = dma.done.wait [#allocation6], 256  }
  0x18   :  { %148 = vsyncadd [#allocation6], 4294967040  ;;  %v151_v0 = vmov 0.0   ;;  %v40_v1 = vld [vmem:[#allocation3] sm:$0xff]  ;;  %v41_v2 = vld [vmem:[#allocation3 + $0x8] sm:$0xff]  ;;  %vm84_vm0 = vcmask 1041408  }
  0x19   :  { %39 = vst [vmem:[#allocation2] sm:$0x3] %v151_v0  ;;  %v46_v3 = vld [vmem:[#allocation5] sm:$0xff]  ;;  %v42_v4 = vmax.f32 %v40_v1, 0.0  ;;  %v43_v5 = vmax.f32 %v41_v2, 0.0  ;;  %v47_v6 = vld [vmem:[#allocation5 + $0x8] sm:$0xff] }
  0x1a   :  { %v48_v7 = vmax.f32 %v46_v3, 0.0  ;;  %v49_v8 = vmax.f32 %v47_v6, 0.0  ;;  %vm92_vm1 = vcmask 1024  }
  0x1b   :  { %v44_v9 = vmin.f32 %v42_v4, 1.0  ;;  %v45_v10 = vmin.f32 %v43_v5, 1.0 }
  0x1c   :  { %v50_v11 = vmin.f32 %v48_v7, 1.0  ;;  %v51_v12 = vmin.f32 %v49_v8, 1.0 }
  0x1e   :  { %v52_v13 = vsub.f32 %v44_v9, %v50_v11  ;;  %v53_v14 = vsub.f32 %v45_v10, %v51_v12 }
  0x20   :  { %v54_v15 = vmul.f32 %v52_v13, %v52_v13  ;;  %v55_v16 = vmul.f32 %v53_v14, %v53_v14  ;;  %v77_v29 = vld [vmem:[#allocation2] sm:$0x3] }
  0x22   :  { %v57_v17 = vrot.slane %v54_v15, 2  ;;  %v60_v18 = vrot.slane %v54_v15, 4  ;;  %v62_v19 = vrot.slane %v54_v15, 6  ;;  %v66_v20 = vrot.slane %v55_v16, 2 }
  0x23   :  { %v69_v21 = vrot.slane %v55_v16, 4  ;;  %v71_v22 = vrot.slane %v55_v16, 6 }
  0x24   :  { %v59_v23 = vadd.f32 %v57_v17, %v54_v15  ;;  %v64_v24 = vadd.f32 %v62_v19, %v60_v18  ;;  %v68_v25 = vadd.f32 %v66_v20, %v55_v16 }
  0x25   :  { %v73_v26 = vadd.f32 %v71_v22, %v69_v21 }
  0x26   :  { %v74_v27 = vadd.f32 %v64_v24, %v59_v23 }
  0x27   :  { %v75_v28 = vadd.f32 %v73_v26, %v68_v25 }
  0x29   :  { %v76_v30 = vadd.f32 %v75_v28, %v74_v27 }
  0x2b   :  { %v78_v31 = vadd.f32 %v77_v29, %v76_v30 }
  0x2d   :  { %79 = vst [vmem:[#allocation2] sm:$0x3] %v78_v31 }
  0x34   :  { %v83_v32 = vld [vmem:[#allocation2] sm:$0x3] }
  0x35   :  { %v85_v33 = vsel %vm84_vm0, %v83_v32, 0.0 }
  0x36   :  { %86 = vadd.xlane.f32.xlu0 %v85_v33 }
  0xbf   :  { %v87_v34 = vpop.xlane.xlu0 %86 }
  0xc0   :  { %103 = vlog2.f32 %v87_v34 }
  0xcd   :  { %v104_v35 = vpop.eup %103 }
  0xce   :  { %v89_v36 = vmul.f32 0.6931472, %v104_v35 }
  0xd0   :  { %v90_v37 = vmul.f32 4.3429446, %v89_v36 }
  0xd2   :  { %v91_v38 = vsub.f32 30.102999, %v90_v37 }
  0xd4   :  { %93 = vst.msk [vmem:[%s178_s2] sm:$0x3] %vm92_vm1, %v91_v38 }
  0xd5   :  { %98 = vsyncpa [#allocation4], 1 }
  0xd6   :  { %99 = vsyncpa [#allocation6], 1 }

</bundles_post_ra>
